<compile_context>
chip_gen: v5e
topology: v5e:2x2
jax: 0.10.0
libtpu: 0.0.40
codegen_flags: <defaults>
</compile_context>

<pallas_src>
import functools

import jax
import jax.numpy as jnp
from jax.experimental import pallas as pl
from jax.experimental.pallas import tpu as pltpu


def _round_up(n, m):
    return ((n + m - 1) // m) * m


def _gvq_kernel(x_ref, w_ref, b_ref, cb_ref, q_ref, psum_ref,
                *, num_groups, num_vars, v_pad, n_valid):
    """One grid step processes a tile of `tm` rows of the flattened [B*T, F] input.

    x_ref    : (tm, F)      input feature tile (compute dtype)
    w_ref    : (F, G*Vp)    projection weight, group-padded, transposed
    b_ref    : (1, G*Vp)    projection bias (f32; padded lanes zero)
    cb_ref   : (G, Vp, D)   per-group codebook (padded rows zero)
    q_ref    : (tm, G*D)    quantized output tile
    psum_ref : (8, G*Vp)    per-tile partial prob sums (row 0; rows 1..7 zero)
    n_valid  : static int or None; rows >= n_valid are padding (excluded from psum)
    """
    G, V, Vp = num_groups, num_vars, v_pad
    GVp = G * Vp
    tm = x_ref.shape[0]
    cdt = x_ref.dtype
    D = cb_ref.shape[-1]

    # Projection on the MXU, f32 accumulation regardless of operand dtype.
    logits = jnp.dot(x_ref[...], w_ref[...],
                     preferred_element_type=jnp.float32) + b_ref[...]

    # Small (1, Vp) iota reused by every group (broadcasts against (tm, 1) / (tm, Vp)).
    col_v = jax.lax.broadcasted_iota(jnp.int32, (1, Vp), 1)
    neg = jnp.float32(-1e30)

    # Row validity folded into the per-row normalisation factor: (tm, 1) work only,
    # no full-width row-mask pass on any tile.  Skipped entirely when N % tm == 0.
    if n_valid is not None:
        rows = pl.program_id(0) * tm + jax.lax.broadcasted_iota(jnp.int32, (tm, 1), 0)
        row_ok = (rows < n_valid).astype(jnp.float32)
    else:
        row_ok = None

    p_sums = []
    for g in range(G):  # static unroll; G is a tiny constant
        # Lane-aligned static slice (Vp % 128 == 0): no cross-lane relayout.
        lg = logits[:, g * Vp:(g + 1) * Vp]
        if Vp != V:
            lg = jnp.where(col_v < V, lg, neg)     # exclude padded lanes
        m_g = jnp.max(lg, axis=-1, keepdims=True)
        # First-maximal-index tie-breaking within the group, same as the reference.
        idx_g = jnp.argmax(lg, axis=-1)
        e_g = jnp.exp(lg - m_g)                    # padded lanes underflow to 0
        inv = 1.0 / jnp.sum(e_g, axis=-1, keepdims=True)   # exact divide: ppl parity
        if row_ok is not None:
            inv = inv * row_ok
        p_sums.append(jnp.sum(e_g * inv, axis=0, keepdims=True))       # (1, Vp)

        # Codebook lookup for this group: (tm, Vp) one-hot x (Vp, D) on the MXU.
        onehot_g = (col_v == idx_g[:, None]).astype(cdt)                # exact in bf16
        q_g = jnp.dot(onehot_g, cb_ref[g], preferred_element_type=jnp.float32)
        q_ref[:, g * D:(g + 1) * D] = q_g.astype(q_ref.dtype)

    # Per-tile partial prob sums -> independent output block per grid step, so the
    # grid axis stays "parallel" (no carried accumulator).  Rows 1..7 must stay zero
    # (the wrapper sums all rows).
    s_full = jnp.concatenate(p_sums, axis=-1)                           # (1, GVp)
    row8 = jax.lax.broadcasted_iota(jnp.int32, (8, GVp), 0)
    psum_ref[...] = jnp.where(row8 == 0, s_full, 0.0)


def gumbel_vq_forward(x, w_proj, b_proj, vars_p, *, num_groups, num_vars,
                      tm=1024, compute_dtype=jnp.bfloat16, out_dtype=None):
    """x: [B, T, F].  Returns (quantized [B, T, vq_dim], prob_ppl scalar).

    tm            : row tile (rounded to x8, clamped; 2048 is fine on v5e/v6e).
    compute_dtype : MXU operand dtype.  bf16 (default) halves DMA traffic and runs the
                    MXU at full rate on all generations, but can flip argmax on
                    near-tied logits vs. the f32 PyTorch module; pass jnp.float32 for
                    bit-faithful parity validation.
    out_dtype     : dtype of quantized output (default: x.dtype).
    """
    B, T, F = x.shape
    G, V = num_groups, num_vars
    D = vars_p.shape[-1]              # var_dim = vq_dim // G
    GD = G * D
    N = B * T
    Vp = _round_up(V, 128)            # lane-aligned per-group width
    GVp = G * Vp
    out_dtype = x.dtype if out_dtype is None else out_dtype

    # Tile sizing: big tiles amortize the ~0.35us/step overhead and feed the MXU wide
    # LHS blocks; prefer >= 2 tiles so the "parallel" axis spans both TCs on v7x.
    tm_eff = max(8, (min(tm, _round_up(N, 8)) // 8) * 8)
    if pl.cdiv(N, tm_eff) < 2 and N > 8:
        tm_eff = max(8, _round_up(pl.cdiv(N, 2), 8))
    num_tiles = pl.cdiv(N, tm_eff)
    N_pad = num_tiles * tm_eff

    x_flat = x.reshape(N, F).astype(compute_dtype)
    if N_pad != N:
        x_flat = jnp.pad(x_flat, ((0, N_pad - N), (0, 0)))

    # Parameter glue (plain JAX, outside the kernel): group-padded transposed weight,
    # padded bias, and the per-group padded codebook (no block-diagonal zeros).
    w3 = jnp.pad(w_proj.reshape(G, V, F), ((0, 0), (0, Vp - V), (0, 0)))
    w_t = w3.reshape(GVp, F).T.astype(compute_dtype)                     # (F, GVp)
    b2 = jnp.pad(b_proj.reshape(G, V), ((0, 0), (0, Vp - V))
                 ).reshape(1, GVp).astype(jnp.float32)                   # (1, GVp)
    cb = jnp.pad(vars_p.reshape(G, V, D), ((0, 0), (0, Vp - V), (0, 0))
                 ).astype(compute_dtype)                                 # (G, Vp, D)

    kernel = functools.partial(
        _gvq_kernel, num_groups=G, num_vars=V, v_pad=Vp,
        n_valid=(N if N_pad != N else None))

    q_flat, psums = pl.pallas_call(
        kernel,
        out_shape=(
            jax.ShapeDtypeStruct((N_pad, GD), out_dtype),
            jax.ShapeDtypeStruct((num_tiles * 8, GVp), jnp.float32),
        ),
        grid=(num_tiles,),
        in_specs=[
            pl.BlockSpec((tm_eff, F), lambda i: (i, 0)),
            pl.BlockSpec((F, GVp), lambda i: (0, 0)),
            pl.BlockSpec((1, GVp), lambda i: (0, 0)),
            pl.BlockSpec((G, Vp, D), lambda i: (0, 0, 0)),
        ],
        out_specs=(
            pl.BlockSpec((tm_eff, GD), lambda i: (i, 0)),
            pl.BlockSpec((8, GVp), lambda i: (i, 0)),
        ),
        compiler_params=pltpu.CompilerParams(
            # Carry-free grid -> shards across TensorCores on v7x; neutral elsewhere.
            dimension_semantics=("parallel",),
            # 48 MiB: above v5e (16) / v6e (32) scoped defaults, under v7x's 64 MiB
            # physical VMEM with headroom for compiler-internal scratch.
            vmem_limit_bytes=48 << 20),
    )(x_flat, w_t, b2, cb)

    # Fold per-tile partials: sum over tiles, drop padded lanes, sum over groups,
    # mean over B*T*G rows (matches torch softmax(...).mean(0) over the (N*G, V) view).
    avg_probs = psums.sum(axis=0).reshape(G, Vp)[:, :V].sum(axis=0) / (N * G)
    prob_ppl = jnp.exp(-jnp.sum(avg_probs * jnp.log(avg_probs + 1e-7)))
    return q_flat[:N].reshape(B, T, GD), prob_ppl


def reference_forward(x, w_proj, b_proj, vars_p, *, num_groups, num_vars):
    """Pure-JAX reference matching the PyTorch eval-mode forward."""
    B, T, F = x.shape
    G, V = num_groups, num_vars
    D = vars_p.shape[-1]
    N = B * T
    logits = x.reshape(N, F) @ w_proj.T + b_proj            # (N, G*V)
    lg = logits.reshape(N * G, V)
    probs = jax.nn.softmax(lg, axis=-1)
    avg_probs = probs.mean(0)
    prob_ppl = jnp.exp(-jnp.sum(avg_probs * jnp.log(avg_probs + 1e-7)))
    idx = jnp.argmax(lg, axis=-1)
    onehot = jax.nn.one_hot(idx, V, dtype=jnp.float32).reshape(N, G, V)
    vars3 = vars_p.reshape(G, V, D)
    q = jnp.einsum('ngv,gvd->ngd', onehot, vars3).reshape(B, T, G * D)
    return q, prob_ppl


def _run_case(B, T, dim, num_vars, num_groups, vq_dim, tm, seed):
    key = jax.random.PRNGKey(seed)
    kx, kw, kv = jax.random.split(key, 3)
    x = jax.random.normal(kx, (B, T, dim), dtype=jnp.float32)
    # Deterministic parameter init mirroring nn.init in __init__:
    w_proj = jax.random.normal(kw, (num_groups * num_vars, dim), dtype=jnp.float32)  # N(0,1)
    b_proj = jnp.zeros((num_groups * num_vars,), jnp.float32)                        # zeros
    vars_p = jax.random.uniform(kv, (num_groups * num_vars, vq_dim // num_groups),
                                dtype=jnp.float32)                                   # U(0,1)

    # f32 parity mode: bit-faithful comparison against the pure-JAX reference.
    q, ppl = gumbel_vq_forward(x, w_proj, b_proj, vars_p,
                               num_groups=num_groups, num_vars=num_vars, tm=tm,
                               compute_dtype=jnp.float32)
    q = jax.block_until_ready(q)
    ppl = jax.block_until_ready(ppl)

    q_ref, ppl_ref = reference_forward(x, w_proj, b_proj, vars_p,
                                       num_groups=num_groups, num_vars=num_vars)
    assert q.shape == (B, T, vq_dim)
    assert jnp.allclose(q, q_ref, atol=1e-5, rtol=1e-5)
    assert jnp.allclose(ppl, ppl_ref, atol=1e-5, rtol=1e-5)

    # Default (bf16) fast path: smoke test only (argmax can legitimately flip on
    # near-tied logits, so no tight element-wise comparison here).
    q_bf, ppl_bf = gumbel_vq_forward(x, w_proj, b_proj, vars_p,
                                     num_groups=num_groups, num_vars=num_vars, tm=tm)
    q_bf = jax.block_until_ready(q_bf)
    ppl_bf = jax.block_until_ready(ppl_bf)
    assert q_bf.shape == (B, T, vq_dim)
    assert bool(jnp.all(jnp.isfinite(q_bf)))
    assert bool(jnp.isfinite(ppl_bf)) and 0.5 < float(ppl_bf) <= num_vars + 1.0


if __name__ == "__main__":
    # Small config consistent with the module (PRNGKey(0)): exercises the forced
    # two-tile split (v7x dual-TC path) at tiny N.
    _run_case(B=2, T=8, dim=32, num_vars=8, num_groups=2, vq_dim=16, tm=1024, seed=0)
    # Multi-tile + padding path (N=150 not a multiple of tm=64): exercises the
    # "parallel" grid, the padded-row handling, and the partial-sum reduction.
    _run_case(B=3, T=50, dim=32, num_vars=8, num_groups=2, vq_dim=16, tm=64, seed=0)
    print("KERNEL_OK")
</pallas_src>

<mosaic_0001>
module attributes {stable_mosaic.version = 11 : i64} {
  func.func @_gvq_kernel(%arg0: i32, %arg1: memref<8x32xf32, #tpu.memory_space<vmem>>, %arg2: memref<32x256xf32, #tpu.memory_space<vmem>>, %arg3: memref<1x256xf32, #tpu.memory_space<vmem>>, %arg4: memref<2x128x8xf32, #tpu.memory_space<vmem>>, %arg5: memref<8x16xf32, #tpu.memory_space<vmem>>, %arg6: memref<8x256xf32, #tpu.memory_space<vmem>>) attributes {dimension_semantics = [#tpu.dimension_semantics<parallel>], iteration_bounds = array<i64: 2>, scalar_prefetch = 0 : i64, scratch_operands = 0 : i64, tpu.core_type = #tpu.core_type<tc>, window_params = [{transform_indices = @transform_0, window_bounds = array<i64: 8, 32>}, {pipeline_mode = #tpu.pipeline_mode<synchronous>, transform_indices = @transform_1, window_bounds = array<i64: 32, 256>}, {pipeline_mode = #tpu.pipeline_mode<synchronous>, transform_indices = @transform_2, window_bounds = array<i64: 1, 256>}, {pipeline_mode = #tpu.pipeline_mode<synchronous>, transform_indices = @transform_3, window_bounds = array<i64: 2, 128, 8>}, {transform_indices = @transform_4, window_bounds = array<i64: 8, 16>}, {transform_indices = @transform_5, window_bounds = array<i64: 8, 256>}]} {
    %c0 = arith.constant 0 : index
    %c0_0 = arith.constant 0 : index
    %0 = vector.load %arg1[%c0, %c0_0] : memref<8x32xf32, #tpu.memory_space<vmem>>, vector<8x32xf32>
    %c0_1 = arith.constant 0 : index
    %c0_2 = arith.constant 0 : index
    %1 = vector.load %arg2[%c0_1, %c0_2] : memref<32x256xf32, #tpu.memory_space<vmem>>, vector<32x256xf32>
    %cst = arith.constant dense<0.000000e+00> : vector<8x256xf32>
    %2 = tpu.matmul %0, %1, %cst {dimension_numbers = #tpu.dot_dimension_numbers<[1], [0], [0], [1], [0, 0, 1, 1], [], []>} : vector<8x32xf32>, vector<32x256xf32>, vector<8x256xf32> -> vector<8x256xf32>
    %c0_3 = arith.constant 0 : index
    %c0_4 = arith.constant 0 : index
    %3 = vector.load %arg3[%c0_3, %c0_4] : memref<1x256xf32, #tpu.memory_space<vmem>>, vector<1x256xf32>
    %4 = vector.broadcast %3 : vector<1x256xf32> to vector<8x256xf32>
    %5 = arith.addf %2, %4 : vector<8x256xf32>
    %6 = tpu.iota {dimensions = array<i32: 1>} : vector<1x128xi32>
    %7 = vector.extract_strided_slice %5 {offsets = [0, 0], sizes = [8, 128], strides = [1, 1]} : vector<8x256xf32> to vector<8x128xf32>
    %c8_i32 = arith.constant 8 : i32
    %8 = vector.broadcast %c8_i32 : i32 to vector<1x128xi32>
    %9 = arith.cmpi slt, %6, %8 : vector<1x128xi32>
    %cst_5 = arith.constant -1.000000e+30 : f32
    %10 = vector.shape_cast %9 : vector<1x128xi1> to vector<1x128xi1>
    %11 = vector.broadcast %10 : vector<1x128xi1> to vector<8x128xi1>
    %12 = vector.broadcast %cst_5 : f32 to vector<8x128xf32>
    %13 = arith.select %11, %7, %12 : vector<8x128xi1>, vector<8x128xf32>
    %cst_6 = arith.constant dense<0xFF800000> : vector<8xf32>
    %14 = vector.multi_reduction <maximumf>, %13, %cst_6 [1] : vector<8x128xf32> to vector<8xf32>
    %15 = vector.shape_cast %14 : vector<8xf32> to vector<8x1xf32>
    %16 = tpu.reduce_index %13 {axis = 1 : i32, kind = #tpu.reduction_kind<arg_max>} : vector<8x128xf32> -> vector<8xi32>
    %17 = vector.broadcast %15 : vector<8x1xf32> to vector<8x128xf32>
    %18 = arith.subf %13, %17 : vector<8x128xf32>
    %19 = math.exp %18 : vector<8x128xf32>
    %cst_7 = arith.constant dense<0.000000e+00> : vector<8xf32>
    %20 = vector.multi_reduction <add>, %19, %cst_7 [1] : vector<8x128xf32> to vector<8xf32>
    %21 = vector.shape_cast %20 : vector<8xf32> to vector<8x1xf32>
    %cst_8 = arith.constant 1.000000e+00 : f32
    %22 = vector.broadcast %cst_8 : f32 to vector<8x1xf32>
    %23 = arith.divf %22, %21 : vector<8x1xf32>
    %24 = vector.broadcast %23 : vector<8x1xf32> to vector<8x128xf32>
    %25 = arith.mulf %19, %24 : vector<8x128xf32>
    %cst_9 = arith.constant dense<0.000000e+00> : vector<128xf32>
    %26 = vector.multi_reduction <add>, %25, %cst_9 [0] : vector<8x128xf32> to vector<128xf32>
    %27 = vector.shape_cast %26 : vector<128xf32> to vector<1x128xf32>
    %28 = vector.shape_cast %16 : vector<8xi32> to vector<8x1xi32>
    %29 = vector.broadcast %6 : vector<1x128xi32> to vector<8x128xi32>
    %30 = vector.broadcast %28 : vector<8x1xi32> to vector<8x128xi32>
    %31 = arith.cmpi eq, %29, %30 : vector<8x128xi32>
    %32 = arith.extui %31 : vector<8x128xi1> to vector<8x128xi32>
    %33 = arith.sitofp %32 : vector<8x128xi32> to vector<8x128xf32>
    %c0_10 = arith.constant 0 : index
    %c0_11 = arith.constant 0 : index
    %c0_12 = arith.constant 0 : index
    %34 = vector.load %arg4[%c0_10, %c0_11, %c0_12] : memref<2x128x8xf32, #tpu.memory_space<vmem>>, vector<1x128x8xf32>
    %35 = vector.shape_cast %34 : vector<1x128x8xf32> to vector<128x8xf32>
    %cst_13 = arith.constant dense<0.000000e+00> : vector<8x8xf32>
    %36 = tpu.matmul %33, %35, %cst_13 {dimension_numbers = #tpu.dot_dimension_numbers<[1], [0], [0], [1], [0, 0, 1, 1], [], []>} : vector<8x128xf32>, vector<128x8xf32>, vector<8x8xf32> -> vector<8x8xf32>
    %c0_14 = arith.constant 0 : index
    %c0_15 = arith.constant 0 : index
    %37 = vector.load %arg5[%c0_14, %c0_15] : memref<8x16xf32, #tpu.memory_space<vmem>>, vector<8x8xf32>
    tpu.vector_store %arg5[%c0_14, %c0_15], %36 {strides = array<i32>} : memref<8x16xf32, #tpu.memory_space<vmem>>, vector<8x8xf32>,
    %38 = vector.extract_strided_slice %5 {offsets = [0, 128], sizes = [8, 128], strides = [1, 1]} : vector<8x256xf32> to vector<8x128xf32>
    %c8_i32_16 = arith.constant 8 : i32
    %39 = vector.broadcast %c8_i32_16 : i32 to vector<1x128xi32>
    %40 = arith.cmpi slt, %6, %39 : vector<1x128xi32>
    %cst_17 = arith.constant -1.000000e+30 : f32
    %41 = vector.shape_cast %40 : vector<1x128xi1> to vector<1x128xi1>
    %42 = vector.broadcast %41 : vector<1x128xi1> to vector<8x128xi1>
    %43 = vector.broadcast %cst_17 : f32 to vector<8x128xf32>
    %44 = arith.select %42, %38, %43 : vector<8x128xi1>, vector<8x128xf32>
    %cst_18 = arith.constant dense<0xFF800000> : vector<8xf32>
    %45 = vector.multi_reduction <maximumf>, %44, %cst_18 [1] : vector<8x128xf32> to vector<8xf32>
    %46 = vector.shape_cast %45 : vector<8xf32> to vector<8x1xf32>
    %47 = tpu.reduce_index %44 {axis = 1 : i32, kind = #tpu.reduction_kind<arg_max>} : vector<8x128xf32> -> vector<8xi32>
    %48 = vector.broadcast %46 : vector<8x1xf32> to vector<8x128xf32>
    %49 = arith.subf %44, %48 : vector<8x128xf32>
    %50 = math.exp %49 : vector<8x128xf32>
    %cst_19 = arith.constant dense<0.000000e+00> : vector<8xf32>
    %51 = vector.multi_reduction <add>, %50, %cst_19 [1] : vector<8x128xf32> to vector<8xf32>
    %52 = vector.shape_cast %51 : vector<8xf32> to vector<8x1xf32>
    %cst_20 = arith.constant 1.000000e+00 : f32
    %53 = vector.broadcast %cst_20 : f32 to vector<8x1xf32>
    %54 = arith.divf %53, %52 : vector<8x1xf32>
    %55 = vector.broadcast %54 : vector<8x1xf32> to vector<8x128xf32>
    %56 = arith.mulf %50, %55 : vector<8x128xf32>
    %cst_21 = arith.constant dense<0.000000e+00> : vector<128xf32>
    %57 = vector.multi_reduction <add>, %56, %cst_21 [0] : vector<8x128xf32> to vector<128xf32>
    %58 = vector.shape_cast %57 : vector<128xf32> to vector<1x128xf32>
    %59 = vector.shape_cast %47 : vector<8xi32> to vector<8x1xi32>
    %60 = vector.broadcast %6 : vector<1x128xi32> to vector<8x128xi32>
    %61 = vector.broadcast %59 : vector<8x1xi32> to vector<8x128xi32>
    %62 = arith.cmpi eq, %60, %61 : vector<8x128xi32>
    %63 = arith.extui %62 : vector<8x128xi1> to vector<8x128xi32>
    %64 = arith.sitofp %63 : vector<8x128xi32> to vector<8x128xf32>
    %c1 = arith.constant 1 : index
    %c0_22 = arith.constant 0 : index
    %c0_23 = arith.constant 0 : index
    %65 = vector.load %arg4[%c1, %c0_22, %c0_23] : memref<2x128x8xf32, #tpu.memory_space<vmem>>, vector<1x128x8xf32>
    %66 = vector.shape_cast %65 : vector<1x128x8xf32> to vector<128x8xf32>
    %cst_24 = arith.constant dense<0.000000e+00> : vector<8x8xf32>
    %67 = tpu.matmul %64, %66, %cst_24 {dimension_numbers = #tpu.dot_dimension_numbers<[1], [0], [0], [1], [0, 0, 1, 1], [], []>} : vector<8x128xf32>, vector<128x8xf32>, vector<8x8xf32> -> vector<8x8xf32>
    %c0_25 = arith.constant 0 : index
    %c8 = arith.constant 8 : index
    %68 = vector.load %arg5[%c0_25, %c8] : memref<8x16xf32, #tpu.memory_space<vmem>>, vector<8x8xf32>
    tpu.vector_store %arg5[%c0_25, %c8], %67 {strides = array<i32>} : memref<8x16xf32, #tpu.memory_space<vmem>>, vector<8x8xf32>,
    %69 = tpu.concatenate %27, %58 in 1 : vector<1x128xf32>, vector<1x128xf32> -> vector<1x256xf32>
    %70 = tpu.iota {dimensions = array<i32: 0>} : vector<8x256xi32>
    %c0_i32 = arith.constant 0 : i32
    %71 = vector.broadcast %c0_i32 : i32 to vector<8x256xi32>
    %72 = arith.cmpi eq, %70, %71 : vector<8x256xi32>
    %cst_26 = arith.constant 0.000000e+00 : f32
    %73 = vector.shape_cast %69 : vector<1x256xf32> to vector<1x256xf32>
    %74 = vector.broadcast %73 : vector<1x256xf32> to vector<8x256xf32>
    %75 = vector.broadcast %cst_26 : f32 to vector<8x256xf32>
    %76 = arith.select %72, %74, %75 : vector<8x256xi1>, vector<8x256xf32>
    %c0_27 = arith.constant 0 : index
    %c0_28 = arith.constant 0 : index
    %77 = vector.load %arg6[%c0_27, %c0_28] : memref<8x256xf32, #tpu.memory_space<vmem>>, vector<8x256xf32>
    tpu.vector_store %arg6[%c0_27, %c0_28], %76 {strides = array<i32>} : memref<8x256xf32, #tpu.memory_space<vmem>>, vector<8x256xf32>,
    return
  }
  func.func @transform_0(%arg0: i32) -> (i32, i32) {
    %c0_i32 = arith.constant 0 : i32
    %c0_i32_0 = arith.constant 0 : i32
    return %arg0, %c0_i32 : i32, i32
  }
  func.func @transform_1(%arg0: i32) -> (i32, i32) {
    %c0_i32 = arith.constant 0 : i32
    %c0_i32_0 = arith.constant 0 : i32
    %c0_i32_1 = arith.constant 0 : i32
    return %c0_i32, %c0_i32_0 : i32, i32
  }
  func.func @transform_2(%arg0: i32) -> (i32, i32) {
    %c0_i32 = arith.constant 0 : i32
    %c0_i32_0 = arith.constant 0 : i32
    %c0_i32_1 = arith.constant 0 : i32
    return %c0_i32, %c0_i32_0 : i32, i32
  }
  func.func @transform_3(%arg0: i32) -> (i32, i32, i32) {
    %c0_i32 = arith.constant 0 : i32
    %c0_i32_0 = arith.constant 0 : i32
    %c0_i32_1 = arith.constant 0 : i32
    %c0_i32_2 = arith.constant 0 : i32
    return %c0_i32, %c0_i32_0, %c0_i32_1 : i32, i32, i32
  }
  func.func @transform_4(%arg0: i32) -> (i32, i32) {
    %c0_i32 = arith.constant 0 : i32
    %c0_i32_0 = arith.constant 0 : i32
    return %arg0, %c0_i32 : i32, i32
  }
  func.func @transform_5(%arg0: i32) -> (i32, i32) {
    %c0_i32 = arith.constant 0 : i32
    %c0_i32_0 = arith.constant 0 : i32
    return %arg0, %c0_i32 : i32, i32
  }
}

</mosaic_0001>

<bundles_post_ra>
// kernel: tpu_custom_call.1
= control target key start
LH: loop header
LB: loop body
LE: loop exit
PB: predicated region body
PF: predicated region fallthrough
CT: control target
= control target key end

     0   :  { %11 = vsyncpa [#allocation3], 0  ;;  %s1044_s0 = inlined_call_operand.vmem [shape: f32[16,32], index: 0, kind: input, shape index: {}]   ;;  %s1045_s1 = inlined_call_operand.vmem [shape: f32[32,256], index: 1, kind: input, shape index: {}]   ;;  %s1046_s2 = inlined_call_operand.vmem [shape: f32[1,256], index: 2, kind: input, shape index: {}]   ;;  %s1047_s3 = inlined_call_operand.vmem [shape: f32[2,128,8], index: 3, kind: input, shape index: {}]   ;;  %s1048_s4 = inlined_call_operand.hbm [shape: f32[16,16], index: 4, kind: output, shape index: {0}]   ;;  %s1049_s5 = inlined_call_operand.hbm [shape: f32[16,256], index: 5, kind: output, shape index: {1}]  }
   0x1   :  { %13 = vsyncpa [#allocation3 + $0x1], 0 }
   0x2   :  { %14 = vsyncpa [#allocation5], 0 }
   0x3   :  { %16 = vsyncpa [#allocation5 + $0x1], 0  ;;  %s802_s18 = smov 0   ;;  %s804_s19 = smov 0  }
   0x4   :  { %s806_s20 = smov 0   ;;  %s808_s21 = smov 0  }
   0x5 LB: > { %s823_s22 = sadd.s32 4294967295, %s768_s21   ;;  %s583_s23 = sadd.s32 4294967294, %s768_s21   ;;  %s768_s21 = sphi %s808_s21, %s1055_s21   ;;  %s764_s20 = sphi %s806_s20, %s1054_s20   ;;  %s760_s19 = sphi %s804_s19, %s1053_s19   ;;  %s756_s18 = sphi %s802_s18, %s1052_s18  }
   0x6   : > { %s827_s24 = sadd.s32 1, %s768_s21   ;;  %s118_s25 = sadd.s32 1, %s764_s20 }
   0x7   : > { %s115_s26 = ssub.s32 %s768_s21, %s827_s24  ;;  %p128_p0 = scmp.ne.s32.totalorder %s764_s20, %s760_s19 }
   0x8   : > { %p116_p1 = scmp.eq.s32.totalorder %s115_s26, 0  ;;  %p129_p2 = scmp.eq.s32.totalorder %s823_s22, 1 }
   0x9   : > { %p134_p3 = scmp.ne.s32.totalorder %s760_s19, %s756_s18  ;;  %p135_p4 = scmp.eq.s32.totalorder %s583_s23, 1 }
   0xa   : > { %s838_s27 = scalar_select %p116_p1, %s764_s20, %s118_s25  }
   0xb   : > { %p840_p5 = por %p129_p2, %p128_p0  ;;  %p844_p6 = por %p135_p4, %p134_p3 }
   0xc   : > { %p586_p7 = scmp.ge.s32.totalorder %s768_s21, 1  ;;  %p195_p8 = scmp.lt.s32.totalorder %s768_s21, 3 }
   0xe   : > { %p196_p9 = pnand %p586_p7, %p195_p8 }
   0xf   : > { %p227_p10 = scmp.lt.s32.totalorder (!%p196_p9), %s823_s22, 1  ;;  %s771_s12 = smov (!%p196_p9), 8  }
  0x10   : > { %199 = sbr.rel (%p196_p9) target bundleno = 525 (0x20d), region = 36  ;;  %s985_s13 = sand.u32 (!%p196_p9), 1, %s760_s19  }
  0x11   : > { %s587_s14 = sshll.u32 (!%p196_p9), %s985_s13, 3  ;;  %s588_s16 = sshll.u32 (!%p196_p9), %s985_s13, 4 }
  0x12   : > { %s988_s15 = scalar_lea.vmem (!%p196_p9), [#allocation2], %s587_s14  ;;  %s226_s23 = scalar_lea.vmem (!%p196_p9), [#allocation4], %s588_s16 }
  0x13   : > { %s461_s8 = scalar_lea.sflag (!%p196_p9), [#allocation5], %s985_s13  ;;  %s694_s14 = scalar_lea.hbm (!%p196_p9), %s1049_s5, 32 }
  0x15   : > { %v238_v0 = vld [vmem:[%s1045_s1 + $0x30] sm:$0xff]  ;;  %v239_v1 = vld [vmem:[%s1045_s1 + $0x38] sm:$0xff]  ;;  %v236_v2 = vld [vmem:[%s1045_s1 + $0x20] sm:$0xff]  ;;  %s228_s17 = scalar_select %p227_p10, %s823_s22, 1  ;;  %vm246_vm0 = vcmask 261120   ;;  %v290_v16 = vlaneseq  ;;  %v770_v47 = vmov 1.0  }
  0x16   : > { %262 = vmatpush.msra.mxu0 %v238_v0  ;;  %282 = vmatpush.msra.mxu1 %v239_v1  ;;  %v237_v3 = vld [vmem:[%s1045_s1 + $0x28] sm:$0xff]  ;;  %v234_v4 = vld [vmem:[%s1045_s1 + $0x10] sm:$0xff]  ;;  %v235_v5 = vld [vmem:[%s1045_s1 + $0x18] sm:$0xff]  ;;  %vm366_vm10 = vcmask 64512  }
  0x17   : > { %v232_v6 = vld [vmem:[%s1045_s1] sm:$0xff]  ;;  %v233_v7 = vld [vmem:[%s1045_s1 + $0x8] sm:$0xff]  ;;  %s589_s6 = sshll.u32 %s228_s17, 3  ;;  %v610_v9 = vld [vmem:[%s1047_s3 + $0xf8] sm:$0xff]  ;;  %v910_v20 = vand.u32 127, %v290_v16  ;;  %s619_s17 = sshll.u32 %s823_s22, 4 }
  0x18   : > { %263 = vmatpush.msra.mxu0 %v236_v2  ;;  %283 = vmatpush.msra.mxu1 %v237_v3  ;;  %s230_s9 = scalar_lea.vmem %s1044_s0, %s589_s6  ;;  %v609_v10 = vld [vmem:[%s1047_s3 + $0xf0] sm:$0xff]  ;;  %v608_v11 = vld [vmem:[%s1047_s3 + $0xe8] sm:$0xff]  ;;  %v607_v12 = vld [vmem:[%s1047_s3 + $0xe0] sm:$0xff]  ;;  %s486_s30 = scalar_lea.hbm %s1049_s5, %s619_s17 }
  0x19   : > { %v231_v8 = vld [vmem:[%s230_s9] sm:$0xff]  ;;  %420 = vmatpush.msra.mxu3 %v610_v9  ;;  %v606_v13 = vld [vmem:[%s1047_s3 + $0xd8] sm:$0xff]  ;;  %v605_v14 = vld [vmem:[%s1047_s3 + $0xd0] sm:$0xff]  ;;  %vm292_vm1 = vcmp.lt.s32.totalorder %v910_v20, 8  ;;  %s488_s6 = sshll.u32 %s226_s23, 4  ;;  %s490_s7 = sshll.u32 %s486_s30, 4  ;;  %s489_s6 = int_to_ptr.vmem [resolvable:$true] %s488_s6  ;;  %s491_s7 = int_to_ptr.hbm [resolvable:$true] %s490_s7 }
  0x1a   : > { %264 = vmatpush.msra.mxu0 %v234_v4  ;;  %284 = vmatpush.msra.mxu1 %v235_v5  ;;  %v604_v15 = vld [vmem:[%s1047_s3 + $0xc8] sm:$0xff]  ;;  %v603_v17 = vld [vmem:[%s1047_s3 + $0xc0] sm:$0xff]  ;;  %v602_v19 = vld [vmem:[%s1047_s3 + $0xb8] sm:$0xff]  ;;  %s688_s9 = sshra.s32 %s491_s7, 4  ;;  %s689_s9 = int_to_ptr.hbm [resolvable:$true] %s688_s9 }
  0x1b   : > { %421 = vmatpush.msra.mxu3 %v609_v10  ;;  %v240_v18 = vld [vmem:[%s1046_s2] sm:$0x3]  ;;  %v601_v21 = vld [vmem:[%s1047_s3 + $0xb0] sm:$0xff]  ;;  %v600_v24 = vld [vmem:[%s1047_s3 + $0xa8] sm:$0xff]  ;;  %s690_s10 = scalar_lea.hbm %s689_s9, 16  ;;  %p695_p0 = scmp.lt.s32.totalorder %s689_s9, %s1049_s5 }
  0x1c   : > { %265 = vmatpush.msra.mxu0 %v232_v6  ;;  %285 = vmatpush.msra.mxu1 %v233_v7  ;;  %v242_v22 = vperm.slane %v240_v18, 0  ;;  %v243_v23 = vperm.slane %v240_v18, 1  ;;  %v599_v27 = vld [vmem:[%s1047_s3 + $0xa0] sm:$0xff]  ;;  %v598_v30 = vld [vmem:[%s1047_s3 + $0x98] sm:$0xff]  ;;  %v597_v33 = vld [vmem:[%s1047_s3 + $0x90] sm:$0xff]  ;;  %p691_p11 = scmp.ne.s32.totalorder %s689_s9, %s690_s10  ;;  %p696_p1 = scmp.lt.s32.totalorder %s694_s14, %s690_s10 }
  0x1d   : > { %590 = vmatmul.msk.f32.vlgmr.msra.gmra.mxu0 %vm246_vm0, %v231_v8  ;;  %591 = vmatmul.msk.f32.vlgmr.msra.gmra.mxu1 %vm246_vm0, %v231_v8  ;;  %v596_v34 = vld [vmem:[%s1047_s3 + $0x88] sm:$0xff]  ;;  %v595_v35 = vld [vmem:[%s1047_s3 + $0x80] sm:$0xff]  ;;  %v345_v36 = vld [vmem:[%s1047_s3 + $0x78] sm:$0xff] }
  0x1e   : > { %422 = vmatpush.msra.mxu3 %v608_v11  ;;  %v344_v37 = vld [vmem:[%s1047_s3 + $0x70] sm:$0xff]  ;;  %346 = vmatpush.msra.mxu2 %v345_v36  ;;  %v343_v38 = vld [vmem:[%s1047_s3 + $0x68] sm:$0xff]  ;;  %v342_v39 = vld [vmem:[%s1047_s3 + $0x60] sm:$0xff]  ;;  %p692_p12 = pnand %p691_p11, %p840_p5  ;;  %p697_p2 = por %p696_p1, %p695_p0 }
  0x1f   : > { %v341_v40 = vld [vmem:[%s1047_s3 + $0x58] sm:$0xff]  ;;  %v340_v41 = vld [vmem:[%s1047_s3 + $0x50] sm:$0xff]  ;;  %v339_v42 = vld [vmem:[%s1047_s3 + $0x48] sm:$0xff] }
  0x20   : > { %423 = vmatpush.msra.mxu3 %v607_v12  ;;  %347 = vmatpush.msra.mxu2 %v344_v37  ;;  %v338_v45 = vld [vmem:[%s1047_s3 + $0x40] sm:$0xff]  ;;  %v337_v48 = vld [vmem:[%s1047_s3 + $0x38] sm:$0xff]  ;;  %v336_v50 = vld [vmem:[%s1047_s3 + $0x30] sm:$0xff]  ;;  %p693_p13 = pneg %p692_p12 }
  0x21   : > { %v335_v51 = vld [vmem:[%s1047_s3 + $0x28] sm:$0xff]  ;;  %v334_v53 = vld [vmem:[%s1047_s3 + $0x20] sm:$0xff]  ;;  %v333_v55 = vld [vmem:[%s1047_s3 + $0x18] sm:$0xff] }
  0x22   : > { %424 = vmatpush.msra.mxu3 %v606_v13  ;;  %348 = vmatpush.msra.mxu2 %v343_v38  ;;  %v332_v58 = vld [vmem:[%s1047_s3 + $0x10] sm:$0xff]  ;;  %v331_v59 = vld [vmem:[%s1047_s3 + $0x8] sm:$0xff]  ;;  %v330_v61 = vld [vmem:[%s1047_s3] sm:$0xff]  ;;  %p698_p3 = pnand %p697_p2, %p693_p13 }
  0x24   : > { %425 = vmatpush.msra.mxu3 %v605_v14  ;;  %349 = vmatpush.msra.mxu2 %v342_v39 }
  0x26   : > { %426 = vmatpush.msra.mxu3 %v604_v15  ;;  %350 = vmatpush.msra.mxu2 %v341_v40 }
  0x28   : > { %427 = vmatpush.msra.mxu3 %v603_v17  ;;  %351 = vmatpush.msra.mxu2 %v340_v41 }
  0x2a   : > { %428 = vmatpush.msra.mxu3 %v602_v19  ;;  %352 = vmatpush.msra.mxu2 %v339_v42 }
  0x2c   : > { %429 = vmatpush.msra.mxu3 %v601_v21  ;;  %353 = vmatpush.msra.mxu2 %v338_v45 }
  0x2e   : > { %430 = vmatpush.msra.mxu3 %v600_v24  ;;  %354 = vmatpush.msra.mxu2 %v337_v48 }
  0x30   : > { %431 = vmatpush.msra.mxu3 %v599_v27  ;;  %355 = vmatpush.msra.mxu2 %v336_v50 }
  0x32   : > { %432 = vmatpush.msra.mxu3 %v598_v30  ;;  %356 = vmatpush.msra.mxu2 %v335_v51  ;;  %v447_v30 = vshrl.u32 %v290_v16, 7 }
  0x34   : > { %433 = vmatpush.msra.mxu3 %v597_v33  ;;  %357 = vmatpush.msra.mxu2 %v334_v53  ;;  %vm448_vm13 = vcmp.eq.s32.totalorder %v447_v30, 0 }
  0x36   : > { %434 = vmatpush.msra.mxu3 %v596_v34  ;;  %358 = vmatpush.msra.mxu2 %v333_v55 }
  0x38   : > { %435 = vmatpush.msra.mxu3 %v595_v35  ;;  %359 = vmatpush.msra.mxu2 %v332_v58 }
  0x3a   : > { %360 = vmatpush.msra.mxu2 %v331_v59 }
  0x3c   : > { %361 = vmatpush.msra.mxu2 %v330_v61 }
  0x9a   : > { %v267_v25 = vpop.f32.mrf.mxu0  ;;  %v287_v26 = vpop.f32.mrf.mxu1 }
  0x9b   : > { %v268_v28 = vadd.f32 %v267_v25, %v242_v22  ;;  %v288_v29 = vadd.f32 %v287_v26, %v243_v23 }
  0x9d   : > { %v368_v31 = vsel %vm292_vm1, %v288_v29, -1e+30  ;;  %v295_v32 = vsel %vm292_vm1, %v268_v28, -1e+30 }
  0x9e   : > { %371 = vmax.index.xlane.f32.xlu0 %v368_v31  ;;  %296 = vmax.xlane.f32.xlu1 %v295_v32 }
  0xa6   : > { %369 = vmax.xlane.f32.xlu1 %v368_v31  ;;  %298 = vmax.index.xlane.f32.xlu0 %v295_v32 }
 0x111   : > { %v372_v43 = vpop.xlane.xlu0 %371  ;;  %v297_v44 = vpop.xlane.xlu1 %296 }
 0x112   : > { %vm400_vm2 = vcmp.eq.s32.totalorder %v910_v20, %v372_v43  ;;  %v300_v46 = vsub.f32 %v295_v32, %v297_v44 }
 0x113   : > { %611 = vmatmul.msk.f32.vlgmr.msra.gmra.mxu3 %vm400_vm2, %v770_v47 }
 0x114   : > { %v301_v49 = vmul.f32 1.442695, %v300_v46 }
 0x116   : > { %666 = vpow2.f32 %v301_v49 }
 0x119   : > { %v370_v52 = vpop.xlane.xlu1 %369  ;;  %v299_v60 = vpop.xlane.xlu0 %298 }
 0x11a   : > { %v373_v54 = vsub.f32 %v368_v31, %v370_v52  ;;  %vm327_vm3 = vcmp.eq.s32.totalorder %v910_v20, %v299_v60 }
 0x11b   : > { %593 = vmatmul.msk.f32.vlgmr.msra.gmra.mxu2 %vm327_vm3, %v770_v47 }
 0x11c   : > { %v667_v56 = vpop.eup %666  ;;  %v374_v57 = vmul.f32 1.442695, %v373_v54 }
 0x11d   : > { %303 = vadd.xlane.f32.xlu2 %v667_v56 }
 0x11e   : > { %668 = vpow2.f32 %v374_v57 }
 0x124   : > { %v669_v62 = vpop.eup %668 }
 0x125   : > { %376 = vadd.xlane.f32.xlu2 %v669_v62 }
 0x190   : > { %v304_v63 = vpop.xlane.xlu2 %303 }
 0x191   : > { %670 = vrcp.f32 %v304_v63  ;;  %v316_v5 = vand.u32 2147483648, %v304_v63  ;;  %v314_v7 = vand.u32 2147483647, %v304_v63  ;;  %vm310_vm5 = vweird.f32 %v304_v63 }
 0x193   : > { %v317_v10 = vor.u32 1.1754944e-38, %v316_v5  ;;  %vm315_vm7 = vcmp.eq.f32.partialorder %v314_v7, 8.507059e+37 }
 0x196   : > { %v437_v0 = vpop.f32.mrf.mxu3 }
 0x197   : > { %v671_v1 = vpop.eup %670  ;;  %441 = vrot.lane.b32.xlu0 %v437_v0, %s771_s12 }
 0x198   : > { %v306_v2 = vmul.f32 %v671_v1, %v304_v63  ;;  %v377_v3 = vpop.xlane.xlu2 %376  ;;  %vm311_vm4 = vweird.f32 %v671_v1 }
 0x199   : > { %672 = vrcp.f32 %v377_v3  ;;  %vm312_vm6 = vmor %vm310_vm5, %vm311_vm4  ;;  %v389_v17 = vand.u32 2147483648, %v377_v3  ;;  %v387_v20 = vand.u32 2147483647, %v377_v3  ;;  %vm383_vm9 = vweird.f32 %v377_v3 }
 0x19a   : > { %v307_v4 = vsub.f32 1.0, %v306_v2 }
 0x19b   : > { %v390_v23 = vor.u32 1.1754944e-38, %v389_v17  ;;  %vm388_vm12 = vcmp.eq.f32.partialorder %v387_v20, 8.507059e+37 }
 0x19c   : > { %v308_v6 = vmul.f32 %v671_v1, %v307_v4 }
 0x19e   : > { %v309_v8 = vadd.f32 %v671_v1, %v308_v6  ;;  %v363_v25 = vpop.f32.mrf.mxu2 }
 0x19f   : > { %v673_v9 = vpop.eup %672  ;;  %367 = vst.msk [vmem:[%s988_s15] sm:$0xff] %vm366_vm10, %v363_v25 }
 0x1a0   : > { %v313_v11 = vsel %vm312_vm6, %v671_v1, %v309_v8  ;;  %v379_v12 = vmul.f32 %v673_v9, %v377_v3  ;;  %vm384_vm8 = vweird.f32 %v673_v9 }
 0x1a1   : > { %v318_v13 = vsel %vm315_vm7, %v317_v10, %v313_v11  ;;  %vm385_vm11 = vmor %vm383_vm9, %vm384_vm8 }
 0x1a2   : > { %v320_v14 = vmul.f32 %v667_v56, %v318_v13  ;;  %v380_v15 = vsub.f32 1.0, %v379_v12 }
 0x1a4   : > { %v321_v18 = vrot.slane %v320_v14, 4  ;;  %v381_v19 = vmul.f32 %v673_v9, %v380_v15 }
 0x1a6   : > { %v382_v21 = vadd.f32 %v673_v9, %v381_v19  ;;  %v322_v22 = vadd.f32 %v321_v18, %v320_v14 }
 0x1a8   : > { %v386_v24 = vsel %vm385_vm11, %v673_v9, %v382_v21  ;;  %v323_v26 = vrot.slane %v322_v22, 2 }
 0x1a9   : > { %v391_v27 = vsel %vm388_vm12, %v390_v23, %v386_v24 }
 0x1aa   : > { %v393_v28 = vmul.f32 %v669_v62, %v391_v27  ;;  %v324_v29 = vadd.f32 %v323_v26, %v322_v22 }
 0x1ac   : > { %v394_v31 = vrot.slane %v393_v28, 4  ;;  %v325_v32 = vrot.slane %v324_v29, 1 }
 0x1ae   : > { %v395_v33 = vadd.f32 %v394_v31, %v393_v28  ;;  %v326_v34 = vadd.f32 %v325_v32, %v324_v29 }
 0x1b0   : > { %v396_v35 = vrot.slane %v395_v33, 2  ;;  %v449_v36 = vperm.slane %v326_v34, 0 }
 0x1b2   : > { %v397_v37 = vadd.f32 %v396_v35, %v395_v33  ;;  %v451_v38 = vsel %vm448_vm13, %v449_v36, 0.0 }
 0x1b3   : > { %453 = vst [vmem:[%s226_s23] sm:$0xff] %v451_v38 }
 0x1b4   : > { %v398_v16 = vrot.slane %v397_v37, 1 }
 0x1b6   : > { %v399_v39 = vadd.f32 %v398_v16, %v397_v37 }
 0x1b8   : > { %v450_v40 = vperm.slane %v399_v39, 0 }
 0x1ba   : > { %v452_v41 = vsel %vm448_vm13, %v450_v40, 0.0 }
 0x1bb   : > { %454 = vst [vmem:[%s226_s23 + $0x8] sm:$0xff] %v452_v41 }
 0x1bc   : > { %701 = shalt.err (!%p698_p3)
}
 0x1bd   : > { %621 = dma.vmem_to_hbm [thread:$0]  (%p840_p5), %s489_s6, 256, %s491_s7, %s461_s8   ;;  %vm444_vm14 = vcmask 130112  }
 0x1be   : > { %s614_s23 = sshll.u32 %s823_s22, 3  ;;  %s473_s11 = sshll.u32 %s988_s15, 4  ;;  %s474_s11 = int_to_ptr.vmem [resolvable:$true] %s473_s11 }
 0x1bf   : > { %s471_s30 = scalar_lea.hbm %s1048_s4, %s614_s23  ;;  %s456_s9 = scalar_lea.sflag [#allocation3], %s985_s13 }
 0x1c0   : > { %s475_s12 = sshll.u32 %s471_s30, 4  ;;  %s722_s7 = scalar_lea.hbm %s1048_s4, 16  ;;  %s476_s12 = int_to_ptr.hbm [resolvable:$true] %s475_s12 }
 0x1c1   : > { %s716_s10 = sshra.s32 %s476_s12, 4  ;;  %s717_s10 = int_to_ptr.hbm [resolvable:$true] %s716_s10 }
 0x1c2   : > { %s718_s14 = scalar_lea.hbm %s717_s10, 8  ;;  %p723_p9 = scmp.lt.s32.totalorder %s717_s10, %s1048_s4 }
 0x1c3   : > { %p719_p4 = scmp.ne.s32.totalorder %s717_s10, %s718_s14  ;;  %p724_p10 = scmp.lt.s32.totalorder %s722_s7, %s718_s14 }
 0x1c5   : > { %p720_p7 = pnand %p719_p4, %p840_p5  ;;  %p725_p11 = por %p724_p10, %p723_p9 }
 0x1c7   : > { %p721_p8 = pneg %p720_p7 }
 0x1c9   : > { %p726_p12 = pnand %p725_p11, %p721_p8 }
 0x209   : > { %v442_v42 = vpop.permute.xlu0 %441 }
 0x20a   : > { %445 = vst.msk [vmem:[%s988_s15] sm:$0xff] %vm444_vm14, %v442_v42 }
 0x20b   : > { %729 = shalt.err (!%p726_p12)
}
 0x20c   : > { %620 = dma.vmem_to_hbm [thread:$0]  (%p840_p5), %s474_s11, 128, %s476_s12, %s456_s9  }
 0x20d PF: > { %p631_p13 = scmp.ge.s32.totalorder %s768_s21, 2  ;;  %s502_s13 = sand.u32 1, %s756_s18  }
 0x20e   : > { %s503_s15 = scalar_lea.sflag [#allocation3], %s502_s13 }
 0x20f   : > { %p625_p0 = pnand %p631_p13, %p844_p6 }
 0x211   : > { %p626_p1 = pneg %p625_p0 }
 0x213   : > { %747 = dma.done.wait (%p626_p1), %s503_s15, 128  }
 0x214   : > { %749 = vsyncadd (%p626_p1), %s503_s15, 4294967168  ;;  %s513_s17 = scalar_lea.sflag [#allocation5], %s502_s13 }
 0x215   : > { %751 = dma.done.wait (%p626_p1), %s513_s17, 256  }
 0x216   : > { %753 = vsyncadd (%p626_p1), %s513_s17, 4294967040  ;;  %p19_p5 = scmp.ge.s32.totalorder %s827_s24, 4   ;;  %s1052_s18 = smov %s760_s19 }
 0x217   : > { %s1053_s19 = smov %s764_s20  ;;  %s1054_s20 = smov %s838_s27 }
 0x218   : > { %s1055_s21 = smov %s827_s24  ;;  %21 = sbr.rel (!%p19_p5) target bundleno = 5 (0x5), region = 89 }
 0x21d   :  { %519 = vsyncpa [#allocation3], 1 }
 0x21e   :  { %521 = vsyncpa [#allocation3 + $0x1], 1 }
 0x21f   :  { %522 = vsyncpa [#allocation5], 1 }
 0x220   :  { %524 = vsyncpa [#allocation5 + $0x1], 1 }

</bundles_post_ra>
